<compile_context>
chip_gen: v6e
topology: v6e:2x2x1
jax: 0.10.0
libtpu: 0.0.40
codegen_flags: <defaults>
</compile_context>

<pallas_src>
import numpy as np
import jax
import jax.numpy as jnp
from jax.experimental import pallas as pl
from jax.experimental.pallas import tpu as pltpu  # noqa: F401  (kept for TPU backend)

BN_EPS = 1e-5
LANE = 128


def _round_up(n, m=LANE):
    return ((n + m - 1) // m) * m


def make_mscale_kernel(num_layers):
    """num_layers = number of fused (weight, bias) pairs = L hidden + 1 output."""

    def kernel(x_ref, *args):
        out_ref = args[-1]
        wb = args[:-1]

        x = x_ref[...]                                   # (B, Din), already f32
        # BatchNorm1d(affine=False), training-mode statistics (biased variance),
        # computed exactly once for all scales.
        mean = jnp.mean(x, axis=0, keepdims=True)
        var = jnp.mean((x - mean) ** 2, axis=0, keepdims=True)
        h = (x - mean) * jax.lax.rsqrt(var + BN_EPS)

        # Hidden layers: fused Linear -> SelfAdaptive(2*a*x) -> tanh.
        # Per-scale input scaling and the 2*a factors are pre-folded into the
        # concatenated / block-diagonal weights, so the body is pure lane-dense
        # matmul + bias + tanh.
        for l in range(num_layers - 1):
            w = wb[2 * l][...]                           # (prev_pad, cur_pad)
            b = wb[2 * l + 1][...]                       # (1, cur_pad)
            h = jnp.tanh(jnp.dot(h, w, preferred_element_type=jnp.float32) + b)

        # Output layer: the cross-scale sum is produced by the concatenated-K dot.
        w = wb[2 * (num_layers - 1)][...]                # (prev_pad, out_pad)
        b = wb[2 * (num_layers - 1) + 1][...]            # (1, out_pad)
        out_ref[...] = jnp.dot(h, w, preferred_element_type=jnp.float32) + b

    return kernel


def _build_fused_params(scales, a_params, weights, biases):
    """Fold scales + SelfAdaptive (2*a) into one lane-dense parameter set.

    Returns (flat_params, out_pad) where flat_params = [W0, b0, ..., WL, bL]:
      W0: (Din, Hp0)        columns = concat_s( scale_s * 2a_{s,0} * W0_s ), zero-padded
      Wl: (Hp_{l-1}, Hp_l)  block-diagonal of 2a_{s,l} * Wl_s, zero-padded
      WL: (Hp_{L-1}, OUTP)  rows = concat_s( WL_s ), zero-padded
      bL: (1, OUTP)         sum_s bL_s, zero-padded
    Zero padding is mathematically inert (pad activations stay exactly 0).
    """
    S = int(scales.shape[0])
    L = int(a_params.shape[1])
    fused = []

    # --- first hidden layer: concatenate scales along the column axis ------
    w0, b0 = weights[0], biases[0]                       # (S, Din, U0), (S, 1, U0)
    Din, U0 = w0.shape[1], w0.shape[2]
    g0 = 2.0 * a_params[:, 0]                            # (S,)
    w0f = w0 * (scales * g0)[:, None, None]
    b0f = b0 * g0[:, None, None]
    W0 = jnp.transpose(w0f, (1, 0, 2)).reshape(Din, S * U0)
    B0 = jnp.transpose(b0f, (1, 0, 2)).reshape(1, S * U0)
    cur_real = S * U0
    cur_pad = _round_up(cur_real)
    fused += [jnp.pad(W0, ((0, 0), (0, cur_pad - cur_real))),
              jnp.pad(B0, ((0, 0), (0, cur_pad - cur_real)))]
    prev_real, prev_pad = cur_real, cur_pad

    # --- remaining hidden layers: block-diagonal over scales ---------------
    eye = jnp.eye(S, dtype=w0.dtype)
    for l in range(1, L):
        wl, bl = weights[l], biases[l]                   # (S, Uprev, Ul), (S, 1, Ul)
        Uprev, Ul = wl.shape[1], wl.shape[2]
        gl = 2.0 * a_params[:, l]
        wlf = wl * gl[:, None, None]
        blf = bl * gl[:, None, None]
        Wbd = (eye[:, None, :, None] * wlf[:, :, None, :]).reshape(S * Uprev, S * Ul)
        Bl = jnp.transpose(blf, (1, 0, 2)).reshape(1, S * Ul)
        cur_real = S * Ul
        cur_pad = _round_up(cur_real)
        fused += [jnp.pad(Wbd, ((0, prev_pad - S * Uprev), (0, cur_pad - cur_real))),
                  jnp.pad(Bl, ((0, 0), (0, cur_pad - cur_real)))]
        prev_real, prev_pad = cur_real, cur_pad

    # --- output layer: concatenate scales along K (rows); sum the biases ---
    wo, bo = weights[L], biases[L]                       # (S, Uprev, out), (S, 1, out)
    Uprev, out_dim = wo.shape[1], wo.shape[2]
    Wo = wo.reshape(S * Uprev, out_dim)
    Bo = jnp.sum(bo, axis=0)                             # (1, out)
    out_pad = _round_up(out_dim)
    fused += [jnp.pad(Wo, ((0, prev_pad - S * Uprev), (0, out_pad - out_dim))),
              jnp.pad(Bo, ((0, 0), (0, out_pad - out_dim)))]
    return fused, out_pad


def mscale_dnn_forward(x, scales, a_params, weights, biases):
    """
    x:        (B, Din)                 float32
    scales:   (S,)                     float32
    a_params: (S, L)                   float32   SelfAdaptive 'a' per scale / hidden layer
    weights:  list of (S, prev, units) float32, length L+1  (PyTorch weights pre-transposed)
    biases:   list of (S, 1, units)    float32, length L+1
    returns   (B, out_dim)             float32
    """
    B, _ = x.shape
    L = int(a_params.shape[1])
    out_dim = int(weights[-1].shape[-1])

    fused, out_pad = _build_fused_params(scales, a_params, weights, biases)

    # Single kernel invocation, no grid: every operand is a whole-array VMEM
    # block; the output is lane-dense (B, out_pad) and sliced afterwards.
    y_pad = pl.pallas_call(
        make_mscale_kernel(L + 1),
        out_shape=jax.ShapeDtypeStruct((B, out_pad), jnp.float32),
    )(x, *fused)

    return y_pad[:, :out_dim]


def mscale_dnn_reference(x, scales, a_params, weights, biases):
    """Pure-JAX reference with the original per-scale structure."""
    mean = jnp.mean(x, axis=0, keepdims=True)
    var = jnp.mean((x - mean) ** 2, axis=0, keepdims=True)
    xn = (x - mean) / jnp.sqrt(var + BN_EPS)
    L = a_params.shape[1]
    out = None
    for s in range(scales.shape[0]):
        h = xn * scales[s]
        for l in range(L):
            h = h @ weights[l][s] + biases[l][s]
            h = jnp.tanh(2.0 * a_params[s, l] * h)
        y = h @ weights[L][s] + biases[L][s]
        out = y if out is None else out + y
    return out


if __name__ == "__main__":
    # Small, deterministic configuration consistent with the module's __init__.
    batch = 16
    input_dim = 2
    hidden_units = [32, 32]
    output_dim = 1
    scales_list = [1.0, 2.0, 4.0]
    S = len(scales_list)
    L = len(hidden_units)

    key = jax.random.PRNGKey(0)
    key, kx = jax.random.split(key)
    x = jax.random.normal(kx, (batch, input_dim), dtype=jnp.float32)

    scales = jnp.asarray(scales_list, dtype=jnp.float32)
    # SelfAdaptive parameter a initialized to 0.5 (nn.Parameter(torch.tensor([0.5])))
    a_params = 0.5 * jnp.ones((S, L), dtype=jnp.float32)

    # Deterministic synthetic weight init (stacked over scales).
    dims = [input_dim] + hidden_units + [output_dim]
    weights, biases = [], []
    for li in range(len(dims) - 1):
        key, kw, kb = jax.random.split(key, 3)
        fan_in, fan_out = dims[li], dims[li + 1]
        w = jax.random.normal(kw, (S, fan_in, fan_out), dtype=jnp.float32)
        w = w * (1.0 / np.sqrt(fan_in))
        b = 0.01 * jax.random.normal(kb, (S, 1, fan_out), dtype=jnp.float32)
        weights.append(w)
        biases.append(b)

    out = mscale_dnn_forward(x, scales, a_params, weights, biases)
    out = jax.block_until_ready(out)

    ref = mscale_dnn_reference(x, scales, a_params, weights, biases)
    np.testing.assert_allclose(np.asarray(out), np.asarray(ref), rtol=1e-4, atol=1e-5)

    print("KERNEL_OK")
</pallas_src>

<mosaic_0001>
module attributes {stable_mosaic.version = 11 : i64} {
  func.func @kernel(%arg0: memref<16x2xf32, #tpu.memory_space<vmem>>, %arg1: memref<2x128xf32, #tpu.memory_space<vmem>>, %arg2: memref<1x128xf32, #tpu.memory_space<vmem>>, %arg3: memref<128x128xf32, #tpu.memory_space<vmem>>, %arg4: memref<1x128xf32, #tpu.memory_space<vmem>>, %arg5: memref<128x128xf32, #tpu.memory_space<vmem>>, %arg6: memref<1x128xf32, #tpu.memory_space<vmem>>, %arg7: memref<16x128xf32, #tpu.memory_space<vmem>>) attributes {dimension_semantics = [], scalar_prefetch = 0 : i64, scratch_operands = 0 : i64, tpu.core_type = #tpu.core_type<tc>} {
    %c0 = arith.constant 0 : index
    %c0_0 = arith.constant 0 : index
    %0 = vector.load %arg0[%c0, %c0_0] : memref<16x2xf32, #tpu.memory_space<vmem>>, vector<16x2xf32>
    %cst = arith.constant dense<0.000000e+00> : vector<2xf32>
    %1 = vector.multi_reduction <add>, %0, %cst [0] : vector<16x2xf32> to vector<2xf32>
    %2 = vector.shape_cast %1 : vector<2xf32> to vector<1x2xf32>
    %cst_1 = arith.constant 1.600000e+01 : f32
    %3 = vector.broadcast %cst_1 : f32 to vector<1x2xf32>
    %4 = arith.divf %2, %3 : vector<1x2xf32>
    %5 = vector.broadcast %4 : vector<1x2xf32> to vector<16x2xf32>
    %6 = arith.subf %0, %5 : vector<16x2xf32>
    %7 = arith.mulf %6, %6 : vector<16x2xf32>
    %cst_2 = arith.constant dense<0.000000e+00> : vector<2xf32>
    %8 = vector.multi_reduction <add>, %7, %cst_2 [0] : vector<16x2xf32> to vector<2xf32>
    %9 = vector.shape_cast %8 : vector<2xf32> to vector<1x2xf32>
    %cst_3 = arith.constant 1.600000e+01 : f32
    %10 = vector.broadcast %cst_3 : f32 to vector<1x2xf32>
    %11 = arith.divf %9, %10 : vector<1x2xf32>
    %12 = vector.broadcast %4 : vector<1x2xf32> to vector<16x2xf32>
    %13 = arith.subf %0, %12 : vector<16x2xf32>
    %cst_4 = arith.constant 9.99999974E-6 : f32
    %14 = vector.broadcast %cst_4 : f32 to vector<1x2xf32>
    %15 = arith.addf %11, %14 : vector<1x2xf32>
    %16 = math.rsqrt %15 : vector<1x2xf32>
    %17 = vector.broadcast %16 : vector<1x2xf32> to vector<16x2xf32>
    %18 = arith.mulf %13, %17 : vector<16x2xf32>
    %c0_5 = arith.constant 0 : index
    %c0_6 = arith.constant 0 : index
    %19 = vector.load %arg1[%c0_5, %c0_6] : memref<2x128xf32, #tpu.memory_space<vmem>>, vector<2x128xf32>
    %c0_7 = arith.constant 0 : index
    %c0_8 = arith.constant 0 : index
    %20 = vector.load %arg2[%c0_7, %c0_8] : memref<1x128xf32, #tpu.memory_space<vmem>>, vector<1x128xf32>
    %cst_9 = arith.constant dense<0.000000e+00> : vector<16x128xf32>
    %21 = tpu.matmul %18, %19, %cst_9 {dimension_numbers = #tpu.dot_dimension_numbers<[1], [0], [0], [1], [0, 0, 1, 1], [], []>} : vector<16x2xf32>, vector<2x128xf32>, vector<16x128xf32> -> vector<16x128xf32>
    %22 = vector.broadcast %20 : vector<1x128xf32> to vector<16x128xf32>
    %23 = arith.addf %21, %22 : vector<16x128xf32>
    %24 = math.tanh %23 : vector<16x128xf32>
    %c0_10 = arith.constant 0 : index
    %c0_11 = arith.constant 0 : index
    %25 = vector.load %arg3[%c0_10, %c0_11] : memref<128x128xf32, #tpu.memory_space<vmem>>, vector<128x128xf32>
    %c0_12 = arith.constant 0 : index
    %c0_13 = arith.constant 0 : index
    %26 = vector.load %arg4[%c0_12, %c0_13] : memref<1x128xf32, #tpu.memory_space<vmem>>, vector<1x128xf32>
    %cst_14 = arith.constant dense<0.000000e+00> : vector<16x128xf32>
    %27 = tpu.matmul %24, %25, %cst_14 {dimension_numbers = #tpu.dot_dimension_numbers<[1], [0], [0], [1], [0, 0, 1, 1], [], []>} : vector<16x128xf32>, vector<128x128xf32>, vector<16x128xf32> -> vector<16x128xf32>
    %28 = vector.broadcast %26 : vector<1x128xf32> to vector<16x128xf32>
    %29 = arith.addf %27, %28 : vector<16x128xf32>
    %30 = math.tanh %29 : vector<16x128xf32>
    %c0_15 = arith.constant 0 : index
    %c0_16 = arith.constant 0 : index
    %31 = vector.load %arg5[%c0_15, %c0_16] : memref<128x128xf32, #tpu.memory_space<vmem>>, vector<128x128xf32>
    %c0_17 = arith.constant 0 : index
    %c0_18 = arith.constant 0 : index
    %32 = vector.load %arg6[%c0_17, %c0_18] : memref<1x128xf32, #tpu.memory_space<vmem>>, vector<1x128xf32>
    %cst_19 = arith.constant dense<0.000000e+00> : vector<16x128xf32>
    %33 = tpu.matmul %30, %31, %cst_19 {dimension_numbers = #tpu.dot_dimension_numbers<[1], [0], [0], [1], [0, 0, 1, 1], [], []>} : vector<16x128xf32>, vector<128x128xf32>, vector<16x128xf32> -> vector<16x128xf32>
    %34 = vector.broadcast %32 : vector<1x128xf32> to vector<16x128xf32>
    %35 = arith.addf %33, %34 : vector<16x128xf32>
    %c0_20 = arith.constant 0 : index
    %c0_21 = arith.constant 0 : index
    %36 = vector.load %arg7[%c0_20, %c0_21] : memref<16x128xf32, #tpu.memory_space<vmem>>, vector<16x128xf32>
    tpu.vector_store %arg7[%c0_20, %c0_21], %35 {strides = array<i32>} : memref<16x128xf32, #tpu.memory_space<vmem>>, vector<16x128xf32>,
    return
  }
}

</mosaic_0001>

<bundles_post_ra>
// kernel: tpu_custom_call.1
= control target key start
LH: loop header
LB: loop body
LE: loop exit
PB: predicated region body
PF: predicated region fallthrough
CT: control target
= control target key end

     0   :  { %12 = vsyncpa [#allocation3], 0  ;;  %s688_s0 = inlined_call_operand.vmem [shape: f32[16,2], index: 0, kind: input, shape index: {}]   ;;  %s689_s1 = inlined_call_operand.vmem [shape: f32[2,128], index: 1, kind: input, shape index: {}]   ;;  %s690_s2 = inlined_call_operand.vmem [shape: f32[1,128], index: 2, kind: input, shape index: {}]   ;;  %s691_s3 = inlined_call_operand.hbm [shape: f32[128,128], index: 3, kind: input, shape index: {}]   ;;  %s692_s4 = inlined_call_operand.vmem [shape: f32[1,128], index: 4, kind: input, shape index: {}]   ;;  %s693_s5 = inlined_call_operand.hbm [shape: f32[128,128], index: 5, kind: input, shape index: {}]   ;;  %s694_s6 = inlined_call_operand.vmem [shape: f32[1,128], index: 6, kind: input, shape index: {}]   ;;  %s695_s7 = inlined_call_operand.hbm [shape: f32[16,128], index: 7, kind: output, shape index: {}]  }
   0x1   :  { %13 = vsyncpa [#allocation6], 0 }
   0x2   :  { %14 = vsyncpa [#allocation4], 0  ;;  %s601_s24 = smov [#allocation2]  }
   0x3   :  { %s26_s25 = sshll.u32 %s601_s24, 4  ;;  %s27_s25 = int_to_ptr.vmem [resolvable:$true] %s26_s25 }
   0x4   :  { %s543_s26 = scalar_lea.vmem %s27_s25, 2048  ;;  %p548_p1 = scmp.lt.s32.totalorder %s27_s25, %s27_s25 }
   0x5   :  { %p544_p0 = scmp.ne.s32.totalorder %s27_s25, %s543_s26  ;;  %p549_p2 = scmp.lt.s32.totalorder %s543_s26, %s543_s26 }
   0x7   :  { %p550_p3 = por %p549_p2, %p548_p1 }
   0x9   :  { %p551_p4 = pnand %p550_p3, %p544_p0 }
   0xb   :  { %554 = shalt.err (!%p551_p4)
}
   0xc   :  { %s602_s27 = smov 128   ;;  %s603_s28 = smov 8  }
   0xd   :  { %32 = dma.hbm_to_vmem [thread:$0]  %s691_s3, 2048, %s27_s25, [#allocation3], %s602_s27, %s602_s27, %s603_s28  }
   0xe   :  { %s604_s8 = smov [#allocation5]  }
   0xf   :  { %s40_s9 = sshll.u32 %s604_s8, 4  ;;  %s41_s9 = int_to_ptr.vmem [resolvable:$true] %s40_s9 }
  0x10   :  { %s563_s10 = scalar_lea.vmem %s41_s9, 2048  ;;  %p568_p6 = scmp.lt.s32.totalorder %s41_s9, %s41_s9 }
  0x11   :  { %p564_p5 = scmp.ne.s32.totalorder %s41_s9, %s563_s10  ;;  %p569_p7 = scmp.lt.s32.totalorder %s563_s10, %s563_s10 }
  0x13   :  { %p570_p8 = por %p569_p7, %p568_p6 }
  0x15   :  { %p571_p9 = pnand %p570_p8, %p564_p5 }
  0x17   :  { %574 = shalt.err (!%p571_p9)
}
  0x18   :  { %46 = dma.hbm_to_vmem [thread:$0]  %s693_s5, 2048, %s41_s9, [#allocation6], %s602_s27, %s602_s27, %s603_s28  }
  0x19   :  { %595 = dma.done.wait [#allocation3], 2048  }
  0x1a   :  { %596 = vsyncadd [#allocation3], 4294965248 }
  0x1b   :  { %597 = dma.done.wait [#allocation6], 2048  }
  0x1c   :  { %598 = vsyncadd [#allocation6], 4294965248  ;;  %vm101_vm0 = vcmask 1041408   ;;  %vm57_vm1 = vcmask 15360   ;;  %v87_v0 = vld [vmem:[%s689_s1] sm:$0x3] }
  0x1d   :  { %v55_v1 = vld [vmem:[%s688_s0] sm:$0xff]  ;;  %v56_v2 = vld [vmem:[%s688_s0 + $0x8] sm:$0xff]  ;;  %445 = vmatprep.subr.msk.mxu0 %vm101_vm0, %v87_v0  ;;  %v197_v5 = vld [vmem:[#allocation2 + $0x78] sm:$0xff]  ;;  %s605_s20 = smov [#allocation7]  }
  0x1e   :  { %v58_v3 = vsel %vm57_vm1, %v55_v1, 0.0  ;;  %v59_v4 = vsel %vm57_vm1, %v56_v2, 0.0  ;;  %v196_v6 = vld [vmem:[#allocation2 + $0x70] sm:$0xff]  ;;  %446 = vmatpush3.msk.msra.mxu0 %vm101_vm0, %v87_v0  ;;  %450 = vmatprep.subr.mxu1 %v197_v5  ;;  %v195_v8 = vld [vmem:[#allocation2 + $0x68] sm:$0xff]  ;;  %v194_v10 = vld [vmem:[#allocation2 + $0x60] sm:$0xff]  ;;  %s387_s21 = sshll.u32 %s605_s20, 4  ;;  %s388_s21 = int_to_ptr.vmem [resolvable:$true] %s387_s21 }
  0x1f   :  { %v60_v7 = vadd.f32 %v59_v4, %v58_v3  ;;  %451 = vmatpush3.msra.mxu1 %v197_v5  ;;  %v193_v12 = vld [vmem:[#allocation2 + $0x58] sm:$0xff]  ;;  %v192_v14 = vld [vmem:[#allocation2 + $0x50] sm:$0xff]  ;;  %v191_v37 = vld [vmem:[#allocation2 + $0x48] sm:$0xff]  ;;  %p580_p11 = scmp.lt.s32.totalorder %s388_s21, %s388_s21 }
  0x20   :  { %452 = vmatprep.subr.mxu1 %v196_v6  ;;  %v190_v38 = vld [vmem:[#allocation2 + $0x40] sm:$0xff]  ;;  %v189_v39 = vld [vmem:[#allocation2 + $0x38] sm:$0xff]  ;;  %v188_v40 = vld [vmem:[#allocation2 + $0x30] sm:$0xff] }
  0x21   :  { %v61_v9 = vrot.slane %v60_v7, 4  ;;  %453 = vmatpush3.msra.mxu1 %v196_v6  ;;  %v187_v41 = vld [vmem:[#allocation2 + $0x28] sm:$0xff]  ;;  %v186_v42 = vld [vmem:[#allocation2 + $0x20] sm:$0xff]  ;;  %v185_v43 = vld [vmem:[#allocation2 + $0x18] sm:$0xff] }
  0x22   :  { %454 = vmatprep.subr.mxu1 %v195_v8  ;;  %v184_v44 = vld [vmem:[#allocation2 + $0x10] sm:$0xff]  ;;  %v183_v45 = vld [vmem:[#allocation2 + $0x8] sm:$0xff]  ;;  %v182_v46 = vld [vmem:[#allocation2] sm:$0xff] }
  0x23   :  { %v62_v11 = vadd.f32 %v61_v9, %v60_v7  ;;  %455 = vmatpush3.msra.mxu1 %v195_v8  ;;  %v297_v47 = vld [vmem:[#allocation5 + $0x78] sm:$0xff]  ;;  %v296_v48 = vld [vmem:[#allocation5 + $0x70] sm:$0xff]  ;;  %v295_v49 = vld [vmem:[#allocation5 + $0x68] sm:$0xff] }
  0x24   :  { %456 = vmatprep.subr.mxu1 %v194_v10  ;;  %485 = vmatprep.subr.mxu0 %v297_v47  ;;  %v294_v50 = vld [vmem:[#allocation5 + $0x60] sm:$0xff]  ;;  %v293_v51 = vld [vmem:[#allocation5 + $0x58] sm:$0xff]  ;;  %v292_v52 = vld [vmem:[#allocation5 + $0x50] sm:$0xff] }
  0x25   :  { %v63_v13 = vrot.slane %v62_v11, 2  ;;  %457 = vmatpush3.msra.mxu1 %v194_v10  ;;  %v400_v53 = vld [vmem:[%s690_s2] ss:$0 sm:$0xff]  ;;  %v291_v60 = vld [vmem:[#allocation5 + $0x48] sm:$0xff]  ;;  %v289_v62 = vld [vmem:[#allocation5 + $0x38] sm:$0xff] }
  0x26   :  { %458 = vmatprep.subr.mxu1 %v193_v12  ;;  %v290_v61 = vld [vmem:[#allocation5 + $0x40] sm:$0xff]  ;;  %v288_v63 = vld [vmem:[#allocation5 + $0x30] sm:$0xff]  ;;  %v287_v0 = vld [vmem:[#allocation5 + $0x28] sm:$0xff] }
  0x27   :  { %v64_v15 = vadd.f32 %v63_v13, %v62_v11  ;;  %459 = vmatpush3.msra.mxu1 %v193_v12  ;;  %v284_v3 = vld [vmem:[#allocation5 + $0x10] sm:$0xff]  ;;  %v283_v4 = vld [vmem:[#allocation5 + $0x8] sm:$0xff]  ;;  %v282_v5 = vld [vmem:[#allocation5] sm:$0xff] }
  0x28   :  { %460 = vmatprep.subr.mxu1 %v192_v14  ;;  %v404_v6 = vld [vmem:[%s692_s4] ss:$0 sm:$0xff]  ;;  %s575_s4 = scalar_lea.vmem %s388_s21, 256 }
  0x29   :  { %v65_v16 = vrot.slane %v64_v15, 1  ;;  %461 = vmatpush3.msra.mxu1 %v192_v14  ;;  %v405_v13 = vld [vmem:[%s694_s6] ss:$0 sm:$0xff]  ;;  %p576_p10 = scmp.ne.s32.totalorder %s388_s21, %s575_s4  ;;  %p581_p12 = scmp.lt.s32.totalorder %s575_s4, %s575_s4 }
  0x2a   :  { %462 = vmatprep.subr.mxu1 %v191_v37 }
  0x2b   :  { %v66_v17 = vadd.f32 %v65_v16, %v64_v15  ;;  %463 = vmatpush3.msra.mxu1 %v191_v37  ;;  %p582_p13 = por %p581_p12, %p580_p11 }
  0x2c   :  { %464 = vmatprep.subr.mxu1 %v190_v38 }
  0x2d   :  { %v68_v18 = vmul.f32 0.0625, %v66_v17  ;;  %465 = vmatpush3.msra.mxu1 %v190_v38  ;;  %p583_p0 = pnand %p582_p13, %p576_p10 }
  0x2e   :  { %466 = vmatprep.subr.mxu1 %v189_v39 }
  0x2f   :  { %v69_v19 = vsub.f32 %v55_v1, %v68_v18  ;;  %v70_v20 = vsub.f32 %v56_v2, %v68_v18  ;;  %467 = vmatpush3.msra.mxu1 %v189_v39  ;;  %v286_v1 = vld [vmem:[#allocation5 + $0x20] sm:$0xff]  ;;  %v285_v2 = vld [vmem:[#allocation5 + $0x18] sm:$0xff] }
  0x30   :  { %468 = vmatprep.subr.mxu1 %v188_v40 }
  0x31   :  { %v71_v21 = vmul.f32 %v69_v19, %v69_v19  ;;  %v72_v22 = vmul.f32 %v70_v20, %v70_v20  ;;  %469 = vmatpush3.msra.mxu1 %v188_v40 }
  0x32   :  { %470 = vmatprep.subr.mxu1 %v187_v41 }
  0x33   :  { %v73_v23 = vsel %vm57_vm1, %v71_v21, 0.0  ;;  %v74_v24 = vsel %vm57_vm1, %v72_v22, 0.0  ;;  %471 = vmatpush3.msra.mxu1 %v187_v41 }
  0x34   :  { %v75_v25 = vadd.f32 %v74_v24, %v73_v23  ;;  %472 = vmatprep.subr.mxu1 %v186_v42 }
  0x35   :  { %473 = vmatpush3.msra.mxu1 %v186_v42 }
  0x36   :  { %v76_v26 = vrot.slane %v75_v25, 4  ;;  %474 = vmatprep.subr.mxu1 %v185_v43 }
  0x37   :  { %475 = vmatpush3.msra.mxu1 %v185_v43 }
  0x38   :  { %v77_v27 = vadd.f32 %v76_v26, %v75_v25  ;;  %476 = vmatprep.subr.mxu1 %v184_v44 }
  0x39   :  { %477 = vmatpush3.msra.mxu1 %v184_v44 }
  0x3a   :  { %v78_v28 = vrot.slane %v77_v27, 2  ;;  %478 = vmatprep.subr.mxu1 %v183_v45 }
  0x3b   :  { %479 = vmatpush3.msra.mxu1 %v183_v45 }
  0x3c   :  { %v79_v29 = vadd.f32 %v78_v28, %v77_v27  ;;  %480 = vmatprep.subr.mxu1 %v182_v46 }
  0x3d   :  { %481 = vmatpush3.msra.mxu1 %v182_v46 }
  0x3e   :  { %v80_v30 = vrot.slane %v79_v29, 1 }
  0x40   :  { %v81_v31 = vadd.f32 %v80_v30, %v79_v29 }
  0x42   :  { %v82_v32 = vmul.f32 0.0625, %v81_v31 }
  0x44   :  { %v83_v33 = vadd.f32 1e-05, %v82_v32 }
  0x46   :  { %525 = vrsqrt.f32 %v83_v33 }
  0x53   :  { %v526_v34 = vpop.eup %525 }
  0x54   :  { %v85_v35 = vmul.f32 %v526_v34, %v69_v19  ;;  %v86_v36 = vmul.f32 %v526_v34, %v70_v20 }
  0x56   :  { %447 = vmatprep.mubr.msk.f32.mxu0 %vm57_vm1, %v85_v35 }
  0x57   :  { %448 = vmatmul.mubr.msk.f32.vlgmr.msra.gmra.mxu0 %vm57_vm1, %v86_v36 }
  0x58   :  { %486 = vmatpush3.msra.mxu0 %v297_v47 }
  0x59   :  { %487 = vmatprep.subr.mxu0 %v296_v48 }
  0x5a   :  { %488 = vmatpush3.msra.mxu0 %v296_v48 }
  0x5b   :  { %489 = vmatprep.subr.mxu0 %v295_v49 }
  0x5c   :  { %490 = vmatpush3.msra.mxu0 %v295_v49 }
  0x5d   :  { %491 = vmatprep.subr.mxu0 %v294_v50 }
  0x5e   :  { %492 = vmatpush3.msra.mxu0 %v294_v50 }
  0x5f   :  { %493 = vmatprep.subr.mxu0 %v293_v51 }
  0x60   :  { %494 = vmatpush3.msra.mxu0 %v293_v51 }
  0x61   :  { %495 = vmatprep.subr.mxu0 %v292_v52 }
  0x62   :  { %496 = vmatpush3.msra.mxu0 %v292_v52 }
  0x63   :  { %497 = vmatprep.subr.mxu0 %v291_v60 }
  0x64   :  { %498 = vmatpush3.msra.mxu0 %v291_v60 }
  0x65   :  { %499 = vmatprep.subr.mxu0 %v290_v61 }
  0x66   :  { %500 = vmatpush3.msra.mxu0 %v290_v61 }
  0x67   :  { %501 = vmatprep.subr.mxu0 %v289_v62 }
  0x68   :  { %502 = vmatpush3.msra.mxu0 %v289_v62 }
  0x69   :  { %503 = vmatprep.subr.mxu0 %v288_v63 }
  0x6a   :  { %504 = vmatpush3.msra.mxu0 %v288_v63 }
  0x6b   :  { %505 = vmatprep.subr.mxu0 %v287_v0 }
  0x6c   :  { %506 = vmatpush3.msra.mxu0 %v287_v0 }
  0x6d   :  { %507 = vmatprep.subr.mxu0 %v286_v1 }
  0x6e   :  { %508 = vmatpush3.msra.mxu0 %v286_v1 }
  0x6f   :  { %509 = vmatprep.subr.mxu0 %v285_v2 }
  0x70   :  { %510 = vmatpush3.msra.mxu0 %v285_v2 }
  0x71   :  { %511 = vmatprep.subr.mxu0 %v284_v3 }
  0x72   :  { %512 = vmatpush3.msra.mxu0 %v284_v3 }
  0x73   :  { %513 = vmatprep.subr.mxu0 %v283_v4 }
  0x74   :  { %514 = vmatpush3.msra.mxu0 %v283_v4 }
  0x75   :  { %515 = vmatprep.subr.mxu0 %v282_v5 }
  0x76   :  { %516 = vmatpush3.msra.mxu0 %v282_v5 }
 0x117   :  { %v449_v54 = vpop.f32.mrf.mxu0 }
 0x118   :  { %v177_v55 = vadd.f32 %v449_v54, %v400_v53 }
 0x119   :  { %v171_v56 = vpop.f32.mrf.mxu0 }
 0x11a   :  { %v172_v57 = vadd.f32 %v400_v53, %v171_v56 }
 0x11c   :  { %527 = vtanh.f32 %v172_v57 }
 0x11d   :  { %529 = vtanh.f32 %v177_v55 }
 0x129   :  { %v528_v58 = vpop.eup %527 }
 0x12a   :  { %v530_v59 = vpop.eup %529  ;;  %482 = vmatprep.mubr.f32.mxu1 %v528_v58 }
 0x12b   :  { %483 = vmatmul.mubr.f32.vlgmr.msra.gmra.mxu1 %v530_v59 }
 0x1eb   :  { %v484_v7 = vpop.f32.mrf.mxu1 }
 0x1ec   :  { %v277_v8 = vadd.f32 %v484_v7, %v404_v6 }
 0x1ed   :  { %v271_v9 = vpop.f32.mrf.mxu1 }
 0x1ee   :  { %v272_v10 = vadd.f32 %v404_v6, %v271_v9 }
 0x1f0   :  { %531 = vtanh.f32 %v272_v10 }
 0x1f1   :  { %533 = vtanh.f32 %v277_v8 }
 0x1fd   :  { %v532_v11 = vpop.eup %531 }
 0x1fe   :  { %v534_v12 = vpop.eup %533  ;;  %517 = vmatprep.mubr.f32.mxu0 %v532_v11 }
 0x1ff   :  { %518 = vmatmul.mubr.f32.vlgmr.msra.gmra.mxu0 %v534_v12 }
 0x2bf   :  { %v519_v14 = vpop.f32.mrf.mxu0 }
 0x2c0   :  { %v377_v15 = vadd.f32 %v519_v14, %v405_v13 }
 0x2c1   :  { %v371_v16 = vpop.f32.mrf.mxu0 }
 0x2c2   :  { %381 = vst [vmem:[#allocation7 + $0x8] sm:$0xff] %v377_v15  ;;  %v372_v17 = vadd.f32 %v405_v13, %v371_v16 }
 0x2c4   :  { %380 = vst [vmem:[#allocation7] sm:$0xff] %v372_v17 }
 0x2c5   :  { %586 = shalt.err (!%p583_p0)
}
 0x2c6   :  { %393 = dma.vmem_to_hbm [thread:$0]  %s388_s21, 256, %s695_s7, [#allocation4], %s602_s27, %s602_s27, %s603_s28  }
 0x2c7   :  { %599 = dma.done.wait [#allocation4], 256  }
 0x2c8   :  { %600 = vsyncadd [#allocation4], 4294967040 }
 0x2c9   :  { %397 = vsyncpa [#allocation3], 1 }
 0x2ca   :  { %398 = vsyncpa [#allocation6], 1 }
 0x2cb   :  { %399 = vsyncpa [#allocation4], 1 }

</bundles_post_ra>
